<compile_context>
chip_gen: v7x
topology: tpu7x:2x2x1
jax: 0.10.0
libtpu: 0.0.40
codegen_flags: <defaults>
</compile_context>

<pallas_src>
import functools
import math

import jax
import jax.numpy as jnp
from jax.experimental import pallas as pl


# ---------------------------------------------------------------------------
# Fiber configuration (synthetic, deterministic): f_key = f_val = {0: 8, 1: 8}
# ---------------------------------------------------------------------------
N_HEADS = 4
F_KEY_STRUCT = [(8, 0), (8, 1)]   # (channels, degree)
F_VAL_STRUCT = [(8, 0), (8, 1)]
F_KEY_NDIMS = sum(c * (2 * d + 1) for c, d in F_KEY_STRUCT)   # 8*1 + 8*3 = 32

N_NODES = 8        # destination nodes
N_NBRS = 8         # incoming edges per destination node (dense graph)


def fiber2head(feat_dict, n_heads, struct_list):
    """Concatenate per-degree features into per-head vectors (glue, plain JAX).

    feat_dict[d] has shape [..., c, 2d+1]; result is [..., n_heads, n_dims//n_heads].
    """
    parts = []
    for c, d in struct_list:
        x = feat_dict[d]
        x = x.reshape(*x.shape[:-2], n_heads, (c // n_heads) * (2 * d + 1))
        parts.append(x)
    return jnp.concatenate(parts, axis=-1)


# ---------------------------------------------------------------------------
# Pallas kernel: single invocation, all nodes at once, lane-dense layout.
#   qT: [Dk, N*H]        qT[d, n*H+h]    = q[n, h, d]
#   kT: [Dk, M, N*H]     kT[d, m, n*H+h] = k[n, m, h, d]
#   vT: [M,  F, N*H]     vT[m, f, n*H+h] = v[n, m, h, f]     (F = F0 + F1)
#   oT: [F,  N*H]        oT[f, n*H+h]    = out[n, h, f]
# ---------------------------------------------------------------------------
def _gmab_kernel(qT_ref, kT_ref, vT_ref, oT_ref, *, scale):
    qT = qT_ref[...]                                   # (Dk, NH)
    kT = kT_ref[...]                                   # (Dk, M, NH)
    vT = vT_ref[...]                                   # (M, F, NH)

    # e_dot_v('k', 'q') / sqrt(n_dims): VPU multiply + reduce over the
    # (untiled) Dk axis.  MXU is intentionally not used at these shapes.
    scores = jnp.sum(kT * qT[:, None, :], axis=0) * scale        # (M, NH)

    # edge_softmax over incoming edges (neighbour axis = sublanes, axis 0)
    smax = jnp.max(scores, axis=0, keepdims=True)                # (1, NH)
    p = jnp.exp(scores - smax)                                   # (M, NH)
    denom = jnp.sum(p, axis=0, keepdims=True)                    # (1, NH)
    attn = p * pl.reciprocal(denom, approx=True)                 # (M, NH)

    # message = attn * value ; aggregate with sum over incoming edges
    oT_ref[...] = jnp.sum(attn[:, None, :] * vT, axis=0)         # (F, NH)


def gmab_se3_forward(qry_dict, key_dict, val_dict):
    """GMABSE3 forward on the dense-neighborhood graph.

    qry_dict[d]: [N, c, 2d+1]         (per destination node)
    key_dict[d]: [N, M, c, 2d+1]      (per edge)
    val_dict[d]: [N, M, c, 2d+1]      (per edge)
    Returns dict {str(d): [N, c_v, 2d+1]}.
    """
    H = N_HEADS
    # --- glue: head-split / flatten (pure reshapes & concat, plain JAX) ---
    q = fiber2head(qry_dict, H, F_KEY_STRUCT)           # [N, H, Dk]
    k = fiber2head(key_dict, H, F_KEY_STRUCT)           # [N, M, H, Dk]

    v_parts, f_sizes = [], []
    for cv, dv in F_VAL_STRUCT:
        v = val_dict[dv].reshape(N_NODES, N_NBRS, H, (cv // H) * (2 * dv + 1))
        v_parts.append(v)
        f_sizes.append(v.shape[-1])
    v = jnp.concatenate(v_parts, axis=-1)               # [N, M, H, F0+F1]

    Dk = q.shape[-1]
    F = v.shape[-1]
    NH = N_NODES * H

    # --- glue: lane-dense layouts for the kernel (layout plumbing) ---
    qT = q.transpose(2, 0, 1).reshape(Dk, NH)                    # [Dk, N*H]
    kT = k.transpose(3, 1, 0, 2).reshape(Dk, N_NBRS, NH)         # [Dk, M, N*H]
    vT = v.transpose(1, 3, 0, 2).reshape(N_NBRS, F, NH)          # [M, F, N*H]

    scale = 1.0 / math.sqrt(F_KEY_NDIMS)
    kernel = functools.partial(_gmab_kernel, scale=scale)

    # Single grid step: whole problem (~18 KB) lives in VMEM; no BlockSpec
    # pipelining needed, no per-step overhead.
    oT = pl.pallas_call(
        kernel,
        out_shape=jax.ShapeDtypeStruct((F, NH), jnp.float32),
    )(qT, kT, vT)

    # --- glue: back to fiber layout [N, c_v, 2d+1] ---
    out = oT.reshape(F, N_NODES, H).transpose(1, 2, 0)           # [N, H, F]
    outputs = {}
    off = 0
    for (cv, dv), fs in zip(F_VAL_STRUCT, f_sizes):
        part = out[..., off:off + fs]                            # [N, H, fs]
        outputs[str(dv)] = part.reshape(N_NODES, cv, 2 * dv + 1)
        off += fs
    return outputs


# ---------------------------------------------------------------------------
# Pure-JAX reference (mirrors the DGL semantics on the dense graph)
# ---------------------------------------------------------------------------
def gmab_se3_reference(qry_dict, key_dict, val_dict):
    H = N_HEADS
    q = fiber2head(qry_dict, H, F_KEY_STRUCT)           # [N, H, Dk]
    k = fiber2head(key_dict, H, F_KEY_STRUCT)           # [N, M, H, Dk]
    e = jnp.einsum("nmhd,nhd->nmh", k, q) / math.sqrt(F_KEY_NDIMS)
    a = jax.nn.softmax(e, axis=1)                       # softmax over incoming edges
    outputs = {}
    for cv, dv in F_VAL_STRUCT:
        v = val_dict[dv].reshape(N_NODES, N_NBRS, H, cv // H, 2 * dv + 1)
        out = jnp.einsum("nmh,nmhcf->nhcf", a, v)
        outputs[str(dv)] = out.reshape(N_NODES, cv, 2 * dv + 1)
    return outputs


if __name__ == "__main__":
    key = jax.random.PRNGKey(0)
    keys = jax.random.split(key, 6)

    qry_dict = {
        0: jax.random.normal(keys[0], (N_NODES, 8, 1), jnp.float32),
        1: jax.random.normal(keys[1], (N_NODES, 8, 3), jnp.float32),
    }
    key_dict = {
        0: jax.random.normal(keys[2], (N_NODES, N_NBRS, 8, 1), jnp.float32),
        1: jax.random.normal(keys[3], (N_NODES, N_NBRS, 8, 3), jnp.float32),
    }
    val_dict = {
        0: jax.random.normal(keys[4], (N_NODES, N_NBRS, 8, 1), jnp.float32),
        1: jax.random.normal(keys[5], (N_NODES, N_NBRS, 8, 3), jnp.float32),
    }

    out = gmab_se3_forward(qry_dict, key_dict, val_dict)
    jax.block_until_ready(out)

    ref = gmab_se3_reference(qry_dict, key_dict, val_dict)
    for d in out:
        assert out[d].shape == ref[d].shape, (out[d].shape, ref[d].shape)
        # tolerance absorbs the approximate EUP reciprocal in the softmax
        if not jnp.allclose(out[d], ref[d], atol=1e-2, rtol=1e-2):
            err = jnp.max(jnp.abs(out[d] - ref[d]))
            raise AssertionError("mismatch on degree %s (max abs err %e)" % (d, err))

    print("KERNEL_OK")
</pallas_src>

<mosaic_0001>
module attributes {stable_mosaic.version = 11 : i64} {
  func.func @_gmab_kernel(%arg0: memref<8x32xf32, #tpu.memory_space<vmem>>, %arg1: memref<8x8x32xf32, #tpu.memory_space<vmem>>, %arg2: memref<8x8x32xf32, #tpu.memory_space<vmem>>, %arg3: memref<8x32xf32, #tpu.memory_space<vmem>>) attributes {dimension_semantics = [], scalar_prefetch = 0 : i64, scratch_operands = 0 : i64, tpu.core_type = #tpu.core_type<tc>} {
    %c0 = arith.constant 0 : index
    %c0_0 = arith.constant 0 : index
    %0 = vector.load %arg0[%c0, %c0_0] : memref<8x32xf32, #tpu.memory_space<vmem>>, vector<8x32xf32>
    %c0_1 = arith.constant 0 : index
    %c0_2 = arith.constant 0 : index
    %c0_3 = arith.constant 0 : index
    %1 = vector.load %arg1[%c0_1, %c0_2, %c0_3] : memref<8x8x32xf32, #tpu.memory_space<vmem>>, vector<8x8x32xf32>
    %c0_4 = arith.constant 0 : index
    %c0_5 = arith.constant 0 : index
    %c0_6 = arith.constant 0 : index
    %2 = vector.load %arg2[%c0_4, %c0_5, %c0_6] : memref<8x8x32xf32, #tpu.memory_space<vmem>>, vector<8x8x32xf32>
    %3 = vector.shape_cast %0 : vector<8x32xf32> to vector<8x1x32xf32>
    %4 = vector.broadcast %3 : vector<8x1x32xf32> to vector<8x8x32xf32>
    %5 = arith.mulf %1, %4 : vector<8x8x32xf32>
    %cst = arith.constant dense<0.000000e+00> : vector<8x32xf32>
    %6 = vector.multi_reduction <add>, %5, %cst [0] : vector<8x8x32xf32> to vector<8x32xf32>
    %cst_7 = arith.constant 0.176776692 : f32
    %7 = vector.broadcast %cst_7 : f32 to vector<8x32xf32>
    %8 = arith.mulf %6, %7 : vector<8x32xf32>
    %cst_8 = arith.constant dense<0xFF800000> : vector<32xf32>
    %9 = vector.multi_reduction <maximumf>, %8, %cst_8 [0] : vector<8x32xf32> to vector<32xf32>
    %10 = vector.shape_cast %9 : vector<32xf32> to vector<1x32xf32>
    %11 = vector.broadcast %10 : vector<1x32xf32> to vector<8x32xf32>
    %12 = arith.subf %8, %11 : vector<8x32xf32>
    %13 = math.exp %12 : vector<8x32xf32>
    %cst_9 = arith.constant dense<0.000000e+00> : vector<32xf32>
    %14 = vector.multi_reduction <add>, %13, %cst_9 [0] : vector<8x32xf32> to vector<32xf32>
    %15 = vector.shape_cast %14 : vector<32xf32> to vector<1x32xf32>
    %16 = tpu.reciprocal %15 {approx = true} : vector<1x32xf32> -> vector<1x32xf32>
    %17 = vector.broadcast %16 : vector<1x32xf32> to vector<8x32xf32>
    %18 = arith.mulf %13, %17 : vector<8x32xf32>
    %19 = vector.shape_cast %18 : vector<8x32xf32> to vector<8x1x32xf32>
    %20 = vector.broadcast %19 : vector<8x1x32xf32> to vector<8x8x32xf32>
    %21 = arith.mulf %20, %2 : vector<8x8x32xf32>
    %cst_10 = arith.constant dense<0.000000e+00> : vector<8x32xf32>
    %22 = vector.multi_reduction <add>, %21, %cst_10 [0] : vector<8x8x32xf32> to vector<8x32xf32>
    %c0_11 = arith.constant 0 : index
    %c0_12 = arith.constant 0 : index
    %23 = vector.load %arg3[%c0_11, %c0_12] : memref<8x32xf32, #tpu.memory_space<vmem>>, vector<8x32xf32>
    tpu.vector_store %arg3[%c0_11, %c0_12], %22 {strides = array<i32>} : memref<8x32xf32, #tpu.memory_space<vmem>>, vector<8x32xf32>,
    return
  }
}

</mosaic_0001>

<bundles_post_ra>
// kernel: tpu_custom_call.1
= control target key start
LH: loop header
LB: loop body
LE: loop exit
PB: predicated region body
PF: predicated region fallthrough
CT: control target
= control target key end

     0   :  { %8 = vsyncpa [#allocation3], 0  ;;  %s573_s0 = inlined_call_operand.hbm [shape: f32[8,32], index: 0, kind: input, shape index: {}]   ;;  %s574_s1 = inlined_call_operand.hbm [shape: f32[8,8,32], index: 1, kind: input, shape index: {}]   ;;  %s575_s2 = inlined_call_operand.hbm [shape: f32[8,8,32], index: 2, kind: input, shape index: {}]   ;;  %s576_s3 = inlined_call_operand.hbm [shape: f32[8,32], index: 3, kind: output, shape index: {}]  }
   0x1   :  { %9 = vsyncpa [#allocation6], 0 }
   0x2   :  { %10 = vsyncpa [#allocation4], 0  ;;  %s441_s12 = smov [#allocation5]   ;;  %s347_s16 = scalar_lea.hbm %s574_s1, 1024 }
   0x3   :  { %s26_s13 = sshll.u32 %s441_s12, 4  ;;  %p348_p0 = scmp.ne.s32.totalorder %s574_s1, %s347_s16  ;;  %s27_s13 = int_to_ptr.vmem [resolvable:$true] %s26_s13 }
   0x4   :  { %p351_p1 = scmp.lt.u32.totalorder %s347_s16, %s574_s1 }
   0x6   :  { %p353_p2 = pnand %p351_p1, %p348_p0 }
   0x8   :  { %356 = shalt.err (!%p353_p2)
}
   0x9   :  { %s357_s21 = scalar_lea.vmem %s27_s13, 1024  ;;  %p362_p4 = scmp.lt.s32.totalorder %s27_s13, %s27_s13 }
   0xa   :  { %p358_p3 = scmp.ne.s32.totalorder %s27_s13, %s357_s21  ;;  %p363_p5 = scmp.lt.s32.totalorder %s357_s21, %s357_s21 }
   0xc   :  { %p364_p6 = por %p363_p5, %p362_p4 }
   0xe   :  { %p365_p7 = pnand %p364_p6, %p358_p3 }
  0x10   :  { %368 = shalt.err (!%p365_p7)
}
  0x11   :  { %s442_s22 = smov 128   ;;  %s443_s23 = smov 8  }
  0x12   :  { %32 = dma.hbm_to_vmem [thread:$0]  %s574_s1, 1024, %s27_s13, [#allocation6], %s442_s22, %s442_s22, %s443_s23  }
  0x13   :  { %s444_s26 = smov [#allocation2]   ;;  %s445_s28 = smov [#allocation7]  }
  0x14   :  { %s17_s27 = sshll.u32 %s444_s26, 4  ;;  %s38_s29 = sshll.u32 %s445_s28, 4  ;;  %s18_s27 = int_to_ptr.vmem [resolvable:$true] %s17_s27  ;;  %s39_s29 = int_to_ptr.vmem [resolvable:$true] %s38_s29 }
  0x15   :  { %s369_s5 = scalar_lea.hbm %s573_s0, 128 }
  0x16   :  { %p370_p8 = scmp.ne.s32.totalorder %s573_s0, %s369_s5  ;;  %p373_p9 = scmp.lt.u32.totalorder %s369_s5, %s573_s0 }
  0x18   :  { %p375_p10 = pnand %p373_p9, %p370_p8 }
  0x1a   :  { %378 = shalt.err (!%p375_p10)
}
  0x1b   :  { %s379_s1 = scalar_lea.vmem %s18_s27, 128  ;;  %p384_p12 = scmp.lt.s32.totalorder %s18_s27, %s18_s27 }
  0x1c   :  { %p380_p11 = scmp.ne.s32.totalorder %s18_s27, %s379_s1  ;;  %p385_p13 = scmp.lt.s32.totalorder %s379_s1, %s379_s1 }
  0x1e   :  { %p386_p0 = por %p385_p13, %p384_p12 }
  0x20   :  { %p387_p1 = pnand %p386_p0, %p380_p11 }
  0x22   :  { %390 = shalt.err (!%p387_p1)
}
  0x23   :  { %20 = dma.hbm_to_vmem [thread:$0]  %s573_s0, 128, %s18_s27, [#allocation3]  }
  0x24   :  { %s391_s14 = scalar_lea.hbm %s575_s2, 1024 }
  0x25   :  { %p392_p2 = scmp.ne.s32.totalorder %s575_s2, %s391_s14  ;;  %p395_p3 = scmp.lt.u32.totalorder %s391_s14, %s575_s2 }
  0x27   :  { %p397_p4 = pnand %p395_p3, %p392_p2 }
  0x29   :  { %400 = shalt.err (!%p397_p4)
}
  0x2a   :  { %s401_s19 = scalar_lea.vmem %s39_s29, 1024  ;;  %p406_p6 = scmp.lt.s32.totalorder %s39_s29, %s39_s29 }
  0x2b   :  { %p402_p5 = scmp.ne.s32.totalorder %s39_s29, %s401_s19  ;;  %p407_p7 = scmp.lt.s32.totalorder %s401_s19, %s401_s19 }
  0x2d   :  { %p408_p8 = por %p407_p7, %p406_p6 }
  0x2f   :  { %p409_p9 = pnand %p408_p8, %p402_p5 }
  0x31   :  { %412 = shalt.err (!%p409_p9)
}
  0x32   :  { %44 = dma.hbm_to_vmem [thread:$0]  %s575_s2, 1024, %s39_s29, [#allocation6], %s442_s22, %s442_s22, %s443_s23  }
  0x33   :  { %435 = dma.done.wait [#allocation3], 128  }
  0x34   :  { %436 = vsyncadd [#allocation3], 4294967168 }
  0x35   :  { %437 = dma.done.wait [#allocation6], 2048  }
  0x36   :  { %438 = vsyncadd [#allocation6], 4294965248  ;;  %v76_v0 = vlaneseq  ;;  %v446_v1 = vmov 1966171168   ;;  %v54_v6 = vld [vmem:[#allocation2] sm:$0xff]  ;;  %v55_v13 = vld [vmem:[#allocation5] sm:$0xff] }
  0x37   :  { %v74_v2 = vunpack.c.l.s4 %v446_v1  ;;  %v72_v7 = vcombine.high %v54_v6, %v54_v6  ;;  %v56_v19 = vld [vmem:[#allocation5 + $0x8] sm:$0xff]  ;;  %v57_v20 = vld [vmem:[#allocation5 + $0x10] sm:$0xff]  ;;  %vm169_vm0 = vcmask 261120   ;;  %v58_v24 = vld [vmem:[#allocation5 + $0x18] sm:$0xff]  ;;  %s447_s2 = smov [#allocation8]  }
  0x38   :  { %v77_v3 = vshrl.u32 %v76_v0, 7  ;;  %v59_v29 = vld [vmem:[#allocation5 + $0x20] sm:$0xff]  ;;  %v60_v36 = vld [vmem:[#allocation5 + $0x28] sm:$0xff]  ;;  %v61_v42 = vld [vmem:[#allocation5 + $0x30] sm:$0xff]  ;;  %s325_s21 = sshll.u32 %s447_s2, 4  ;;  %s326_s21 = int_to_ptr.vmem [resolvable:$true] %s325_s21 }
  0x39   :  { %v75_v4 = vunpack.c.0.s8 %v74_v2  ;;  %v62_v47 = vld [vmem:[#allocation5 + $0x38] sm:$0xff]  ;;  %s413_s22 = scalar_lea.vmem %s326_s21, 128  ;;  %p418_p11 = scmp.lt.s32.totalorder %s326_s21, %s326_s21 }
  0x3a   :  { %v513_v9 = vsub.s32 0, %v77_v3  ;;  %p414_p10 = scmp.ne.s32.totalorder %s326_s21, %s413_s22  ;;  %p419_p12 = scmp.lt.s32.totalorder %s413_s22, %s413_s22 }
  0x3b   :  { %v510_v5 = vsub.s32 %v75_v4, %v77_v3 }
  0x3c   :  { %p420_p13 = por %p419_p12, %p418_p11 }
  0x3d   :  { %v79_v8 = vrot.slane %v54_v6, %v510_v5  ;;  %v86_v10 = vrot.slane %v72_v7, %v510_v5 }
  0x3e   :  { %p421_p0 = pnand %p420_p13, %p414_p10 }
  0x3f   :  { %v87_v11 = vcombine.high %v79_v8, %v79_v8  ;;  %v95_v12 = vrot.slane %v79_v8, %v510_v5  ;;  %v88_v14 = vcombine.high %v86_v10, %v86_v10  ;;  %v102_v15 = vrot.slane %v86_v10, %v510_v5 }
  0x41   :  { %v109_v16 = vrot.slane %v87_v11, %v510_v5  ;;  %v117_v17 = vcombine.high %v95_v12, %v95_v12  ;;  %v124_v18 = vrot.slane %v95_v12, %v513_v9  ;;  %v116_v21 = vrot.slane %v88_v14, %v510_v5 }
  0x42   :  { %v118_v25 = vcombine.high %v102_v15, %v102_v15  ;;  %v140_v27 = vrot.slane %v102_v15, %v513_v9 }
  0x43   :  { %v119_v22 = vcombine.high %v109_v16, %v109_v16  ;;  %v128_v23 = vrot.slane %v109_v16, %v513_v9  ;;  %v132_v26 = vrot.slane %v117_v17, %v513_v9  ;;  %v161_v28 = vmul.f32 %v124_v18, %v55_v13 }
  0x44   :  { %v120_v30 = vcombine.high %v116_v21, %v116_v21  ;;  %v144_v32 = vrot.slane %v116_v21, %v513_v9  ;;  %v148_v38 = vrot.slane %v118_v25, %v513_v9  ;;  %v165_v39 = vmul.f32 %v140_v27, %v59_v29  ;;  %v64_v29 = vld [vmem:[#allocation7 + $0x8] sm:$0xff] }
  0x45   :  { %v136_v31 = vrot.slane %v119_v22, %v513_v9  ;;  %v162_v33 = vmul.f32 %v128_v23, %v56_v19  ;;  %v163_v34 = vmul.f32 %v132_v26, %v57_v20  ;;  %v170_v35 = vsel %vm169_vm0, %v161_v28, 0.0  ;;  %v63_v23 = vld [vmem:[#allocation7] sm:$0xff] }
  0x46   :  { %v152_v44 = vrot.slane %v120_v30, %v513_v9  ;;  %v166_v45 = vmul.f32 %v144_v32, %v60_v36  ;;  %v167_v49 = vmul.f32 %v148_v38, %v61_v42  ;;  %v177_v50 = vsel %vm169_vm0, %v165_v39, 0.0  ;;  %v65_v30 = vld [vmem:[#allocation7 + $0x10] sm:$0xff]  ;;  %v67_v39 = vld [vmem:[#allocation7 + $0x20] sm:$0xff] }
  0x47   :  { %v164_v37 = vmul.f32 %v136_v31, %v58_v24  ;;  %v171_v40 = vsel %vm169_vm0, %v162_v33, 0.0  ;;  %v173_v41 = vsel %vm169_vm0, %v163_v34, 0.0  ;;  %v66_v34 = vld [vmem:[#allocation7 + $0x18] sm:$0xff] }
  0x48   :  { %v172_v43 = vadd.f32 %v171_v40, %v170_v35  ;;  %v168_v52 = vmul.f32 %v152_v44, %v62_v47  ;;  %v179_v53 = vsel %vm169_vm0, %v166_v45, 0.0  ;;  %v181_v55 = vsel %vm169_vm0, %v167_v49, 0.0  ;;  %v68_v45 = vld [vmem:[#allocation7 + $0x28] sm:$0xff] }
  0x49   :  { %v175_v46 = vsel %vm169_vm0, %v164_v37, 0.0 }
  0x4a   :  { %v174_v48 = vadd.f32 %v173_v41, %v172_v43  ;;  %v183_v57 = vsel %vm169_vm0, %v168_v52, 0.0 }
  0x4c   :  { %v176_v51 = vadd.f32 %v175_v46, %v174_v48 }
  0x4e   :  { %v178_v54 = vadd.f32 %v177_v50, %v176_v51  ;;  %v69_v51 = vld [vmem:[#allocation7 + $0x30] sm:$0xff] }
  0x50   :  { %v180_v56 = vadd.f32 %v179_v53, %v178_v54 }
  0x52   :  { %v182_v58 = vadd.f32 %v181_v55, %v180_v56  ;;  %v70_v56 = vld [vmem:[#allocation7 + $0x38] sm:$0xff] }
  0x54   :  { %v184_v59 = vadd.f32 %v183_v57, %v182_v58 }
  0x56   :  { %v185_v60 = vmul.f32 0.17677669, %v184_v59 }
  0x58   :  { %v186_v61 = vsel %vm169_vm0, %v185_v60, -inf }
  0x59   :  { %v187_v62 = vrot.slane %v186_v61, 4 }
  0x5b   :  { %v188_v63 = vmax.f32 %v186_v61, %v187_v62 }
  0x5d   :  { %v189_v0 = vrot.slane %v188_v63, 2 }
  0x5f   :  { %v190_v1 = vmax.f32 %v188_v63, %v189_v0 }
  0x61   :  { %v191_v2 = vrot.slane %v190_v1, 1 }
  0x63   :  { %v192_v3 = vmax.f32 %v190_v1, %v191_v2 }
  0x65   :  { %v193_v4 = vsub.f32 %v185_v60, %v192_v3 }
  0x67   :  { %v194_v6 = vmul.f32 1.442695, %v193_v4 }
  0x69   :  { %343 = vpow2.f32 %v194_v6 }
  0x73   :  { %v344_v7 = vpop.eup %343 }
  0x74   :  { %v196_v8 = vsel %vm169_vm0, %v344_v7, 0.0 }
  0x75   :  { %v197_v10 = vrot.slane %v196_v8, 4 }
  0x77   :  { %v198_v11 = vadd.f32 %v197_v10, %v196_v8 }
  0x79   :  { %v199_v12 = vrot.slane %v198_v11, 2 }
  0x7b   :  { %v200_v13 = vadd.f32 %v199_v12, %v198_v11 }
  0x7d   :  { %v201_v14 = vrot.slane %v200_v13, 1 }
  0x7f   :  { %v202_v15 = vadd.f32 %v201_v14, %v200_v13 }
  0x81   :  { %345 = vrcp.f32 %v202_v15 }
  0x8b   :  { %v346_v16 = vpop.eup %345 }
  0x8c   :  { %v204_v17 = vmul.f32 %v346_v16, %v344_v7 }
  0x8e   :  { %v206_v18 = vcombine.high %v204_v17, %v204_v17  ;;  %v213_v19 = vrot.slane %v204_v17, %v510_v5 }
  0x90   :  { %v220_v20 = vrot.slane %v206_v18, %v510_v5  ;;  %v221_v21 = vcombine.high %v213_v19, %v213_v19  ;;  %v229_v22 = vrot.slane %v213_v19, %v510_v5 }
  0x92   :  { %v222_v24 = vcombine.high %v220_v20, %v220_v20  ;;  %v236_v25 = vrot.slane %v220_v20, %v510_v5  ;;  %v243_v26 = vrot.slane %v221_v21, %v510_v5  ;;  %v251_v27 = vcombine.high %v229_v22, %v229_v22 }
  0x93   :  { %v258_v28 = vrot.slane %v229_v22, %v513_v9 }
  0x94   :  { %v250_v31 = vrot.slane %v222_v24, %v510_v5  ;;  %v253_v32 = vcombine.high %v243_v26, %v243_v26  ;;  %v262_v33 = vrot.slane %v243_v26, %v513_v9  ;;  %v252_v35 = vcombine.high %v236_v25, %v236_v25 }
  0x95   :  { %v266_v36 = vrot.slane %v251_v27, %v513_v9  ;;  %v274_v37 = vrot.slane %v236_v25, %v513_v9  ;;  %v295_v38 = vmul.f32 %v258_v28, %v63_v23 }
  0x96   :  { %v254_v40 = vcombine.high %v250_v31, %v250_v31  ;;  %v270_v41 = vrot.slane %v253_v32, %v513_v9  ;;  %v278_v42 = vrot.slane %v250_v31, %v513_v9  ;;  %v296_v43 = vmul.f32 %v262_v33, %v64_v29 }
  0x97   :  { %v297_v44 = vmul.f32 %v266_v36, %v65_v30  ;;  %v303_v5 = vsel %vm169_vm0, %v295_v38, 0.0  ;;  %v282_v47 = vrot.slane %v252_v35, %v513_v9  ;;  %v299_v48 = vmul.f32 %v274_v37, %v67_v39 }
  0x98   :  { %v298_v46 = vmul.f32 %v270_v41, %v66_v34  ;;  %v304_v49 = vsel %vm169_vm0, %v296_v43, 0.0  ;;  %v286_v53 = vrot.slane %v254_v40, %v513_v9  ;;  %v300_v54 = vmul.f32 %v278_v42, %v68_v45 }
  0x99   :  { %v306_v50 = vsel %vm169_vm0, %v297_v44, 0.0  ;;  %v305_v52 = vadd.f32 %v304_v49, %v303_v5  ;;  %v301_v58 = vmul.f32 %v282_v47, %v69_v51  ;;  %v310_v59 = vsel %vm169_vm0, %v299_v48, 0.0 }
  0x9a   :  { %v308_v55 = vsel %vm169_vm0, %v298_v46, 0.0  ;;  %v302_v61 = vmul.f32 %v286_v53, %v70_v56  ;;  %v312_v62 = vsel %vm169_vm0, %v300_v54, 0.0 }
  0x9b   :  { %v307_v57 = vadd.f32 %v306_v50, %v305_v52  ;;  %v314_v0 = vsel %vm169_vm0, %v301_v58, 0.0 }
  0x9c   :  { %v316_v2 = vsel %vm169_vm0, %v302_v61, 0.0 }
  0x9d   :  { %v309_v60 = vadd.f32 %v308_v55, %v307_v57 }
  0x9f   :  { %v311_v63 = vadd.f32 %v310_v59, %v309_v60 }
  0xa1   :  { %v313_v1 = vadd.f32 %v312_v62, %v311_v63 }
  0xa3   :  { %v315_v9 = vadd.f32 %v314_v0, %v313_v1 }
  0xa5   :  { %v317_v3 = vadd.f32 %v316_v2, %v315_v9 }
  0xa7   :  { %318 = vst.msk [vmem:[#allocation8] sm:$0xff] %vm169_vm0, %v317_v3 }
  0xa8   :  { %424 = shalt.err (!%p421_p0)
}
  0xa9   :  { %s425_s25 = scalar_lea.hbm %s576_s3, 128 }
  0xaa   :  { %p426_p1 = scmp.ne.s32.totalorder %s576_s3, %s425_s25  ;;  %p429_p2 = scmp.lt.u32.totalorder %s425_s25, %s576_s3 }
  0xac   :  { %p431_p3 = pnand %p429_p2, %p426_p1 }
  0xae   :  { %434 = shalt.err (!%p431_p3)
}
  0xaf   :  { %328 = dma.vmem_to_hbm [thread:$0]  %s326_s21, 128, %s576_s3, [#allocation4]  }
  0xb0   :  { %439 = dma.done.wait [#allocation4], 128  }
  0xb1   :  { %440 = vsyncadd [#allocation4], 4294967168 }
  0xb2   :  { %332 = vsyncpa [#allocation3], 1 }
  0xb3   :  { %333 = vsyncpa [#allocation6], 1 }
  0xb4   :  { %334 = vsyncpa [#allocation4], 1 }

</bundles_post_ra>
